<compile_context>
chip_gen: v5e
topology: v5e:2x2
jax: 0.10.0
libtpu: 0.0.40
codegen_flags: <defaults>
</compile_context>

<pallas_src>
import numpy as np
import jax
import jax.numpy as jnp
from jax.experimental import pallas as pl
from jax.experimental.pallas import tpu as pltpu


# ---------------------------------------------------------------- kernel ----

def _moving_avg_kernel(w_ref, x_ref, o_ref):
    # w_ref: (T_out, T)  x_ref: (T, Nb)  o_ref: (T_out, Nb)
    prec = (jax.lax.Precision.HIGHEST
            if x_ref.dtype == jnp.float32 else None)
    o_ref[...] = jnp.dot(
        w_ref[...], x_ref[...],
        preferred_element_type=jnp.float32,
        precision=prec,
    ).astype(o_ref.dtype)


# --------------------------------------------------------------- wrapper ----

class MovingAvgPallas:
    """JAX/Pallas equivalent of models.TimeMixer.moving_avg."""

    def __init__(self, kernel_size: int, stride: int):
        self.kernel_size = int(kernel_size)
        self.stride = int(stride)

    def _build_weight(self, T: int):
        k, s = self.kernel_size, self.stride
        pad = (k - 1) // 2
        Tp = T + 2 * pad
        T_out = (Tp - k) // s + 1
        o = np.arange(T_out)[:, None]
        j = np.arange(k)[None, :]
        # Replicate (front/end) padding folded in via index clamping.
        t = np.clip(o * s + j - pad, 0, T - 1)               # (T_out, k)
        w = np.zeros((T_out, T), np.float32)
        np.add.at(w, (np.broadcast_to(o, t.shape), t), np.float32(1.0 / k))
        return w, T_out

    @staticmethod
    def _vmem_plan():
        """(tile budget, scoped VMEM limit, is_v7x) per TPU generation."""
        try:
            kind = jax.devices()[0].device_kind.lower()
        except Exception:
            kind = ""
        is_v7x = ("v7" in kind) or ("7x" in kind)
        if is_v7x:
            # 64 MiB VMEM per TensorCore -> leave ~16 MiB headroom.
            return 28 * 1024 * 1024, 48 * 1024 * 1024, True
        # v5e / v6e (and v4/v5p): 128 MiB VMEM, single TensorCore.
        return 56 * 1024 * 1024, 96 * 1024 * 1024, False

    def __call__(self, x):
        B, T, C = x.shape
        w_np, T_out = self._build_weight(T)
        w = jnp.asarray(w_np, dtype=x.dtype)      # matmul in the input dtype
        itemsize = jnp.dtype(x.dtype).itemsize
        N = B * C

        budget, vmem_limit, is_v7x = self._vmem_plan()
        w_bytes = T_out * T * itemsize                       # single-buffered
        # Per lane column: double-buffered x/out blocks + f32 matmul result.
        per_col = 2 * T * itemsize + 2 * T_out * itemsize + T_out * 4
        nb = max(1, (budget - w_bytes) // per_col)
        if nb >= N:
            nb = N                                 # full extent (any width ok)
        else:
            nb = max(128, (nb // 128) * 128)       # lane-aligned tile
        if is_v7x and N >= 256:
            # Keep >= 2 grid steps so both TensorCores get work.
            nb = min(nb, max(128, pl.cdiv(N, 2 * 128) * 128))
        nb = int(min(nb, N))

        # Layout plumbing: time on sublanes, batch*channels on lanes.
        x2 = jnp.transpose(x, (1, 0, 2)).reshape(T, N)

        grid = (pl.cdiv(N, nb),)
        y2 = pl.pallas_call(
            _moving_avg_kernel,
            out_shape=jax.ShapeDtypeStruct((T_out, N), x.dtype),
            grid_spec=pltpu.PrefetchScalarGridSpec(
                num_scalar_prefetch=0,
                grid=grid,
                in_specs=[
                    # W: grid-invariant, resident, single-buffered.
                    pl.BlockSpec((T_out, T), lambda i: (0, 0),
                                 pipeline_mode=pl.Buffered(1)),
                    # x tile: lane-dense slab of batch*channel columns.
                    pl.BlockSpec((T, nb), lambda i: (0, i)),
                ],
                out_specs=pl.BlockSpec((T_out, nb), lambda i: (0, i)),
            ),
            compiler_params=pltpu.CompilerParams(
                dimension_semantics=("parallel",),
                vmem_limit_bytes=vmem_limit,
            ),
            cost_estimate=pl.CostEstimate(
                flops=2 * T_out * T * N,
                transcendentals=0,
                bytes_accessed=(T * N + T_out * N) * itemsize + w_bytes,
            ),
        )(w, x2)

        return jnp.transpose(y2.reshape(T_out, B, C), (1, 0, 2))


# ------------------------------------------------------------- reference ----

def _ref_moving_avg(x, kernel_size, stride):
    pad = (kernel_size - 1) // 2
    front = jnp.repeat(x[:, :1, :], pad, axis=1)
    end = jnp.repeat(x[:, -1:, :], pad, axis=1)
    xp = jnp.concatenate([front, x, end], axis=1)
    Tp = xp.shape[1]
    T_out = (Tp - kernel_size) // stride + 1
    cols = []
    for o in range(T_out):
        s = o * stride
        cols.append(jnp.mean(xp[:, s:s + kernel_size, :], axis=1))
    return jnp.stack(cols, axis=1)


# ------------------------------------------------------------------ main ----

if __name__ == "__main__":
    key = jax.random.PRNGKey(0)
    B, T, C = 2, 16, 8
    x = jax.random.normal(key, (B, T, C), dtype=jnp.float32)

    # Typical TimeMixer decomposition setting: odd kernel, stride 1.
    ma = MovingAvgPallas(kernel_size=5, stride=1)
    y = ma(x)
    jax.block_until_ready(y)
    y_ref = _ref_moving_avg(x, 5, 1)
    assert y.shape == y_ref.shape, (y.shape, y_ref.shape)
    assert jnp.allclose(y, y_ref, atol=1e-5, rtol=1e-5)

    # General path: even kernel + stride > 1.
    ma2 = MovingAvgPallas(kernel_size=4, stride=2)
    y2 = ma2(x)
    jax.block_until_ready(y2)
    y2_ref = _ref_moving_avg(x, 4, 2)
    assert y2.shape == y2_ref.shape, (y2.shape, y2_ref.shape)
    assert jnp.allclose(y2, y2_ref, atol=1e-5, rtol=1e-5)

    print("KERNEL_OK")
</pallas_src>

<mosaic_0001>
module attributes {stable_mosaic.version = 11 : i64} {
  func.func @_moving_avg_kernel(%arg0: i32, %arg1: memref<16x16xf32, #tpu.memory_space<vmem>>, %arg2: memref<16x16xf32, #tpu.memory_space<vmem>>, %arg3: memref<16x16xf32, #tpu.memory_space<vmem>>) attributes {dimension_semantics = [#tpu.dimension_semantics<parallel>], iteration_bounds = array<i64: 1>, scalar_prefetch = 0 : i64, scratch_operands = 0 : i64, tpu.core_type = #tpu.core_type<tc>, window_params = [{pipeline_mode = #tpu.pipeline_mode<synchronous>, transform_indices = @transform_0, window_bounds = array<i64: 16, 16>}, {transform_indices = @transform_1, window_bounds = array<i64: 16, 16>}, {transform_indices = @transform_2, window_bounds = array<i64: 16, 16>}]} {
    %c0 = arith.constant 0 : index
    %c0_0 = arith.constant 0 : index
    %0 = vector.load %arg1[%c0, %c0_0] : memref<16x16xf32, #tpu.memory_space<vmem>>, vector<16x16xf32>
    %c0_1 = arith.constant 0 : index
    %c0_2 = arith.constant 0 : index
    %1 = vector.load %arg2[%c0_1, %c0_2] : memref<16x16xf32, #tpu.memory_space<vmem>>, vector<16x16xf32>
    %cst = arith.constant dense<0.000000e+00> : vector<16x16xf32>
    %2 = tpu.matmul %0, %1, %cst {dimension_numbers = #tpu.dot_dimension_numbers<[1], [0], [0], [1], [0, 0, 1, 1], [], []>, precision = #tpu.contract_precision<fp32>} : vector<16x16xf32>, vector<16x16xf32>, vector<16x16xf32> -> vector<16x16xf32>
    %c0_3 = arith.constant 0 : index
    %c0_4 = arith.constant 0 : index
    %3 = vector.load %arg3[%c0_3, %c0_4] : memref<16x16xf32, #tpu.memory_space<vmem>>, vector<16x16xf32>
    tpu.vector_store %arg3[%c0_3, %c0_4], %2 {strides = array<i32>} : memref<16x16xf32, #tpu.memory_space<vmem>>, vector<16x16xf32>,
    return
  }
  func.func @transform_0(%arg0: i32) -> (i32, i32) {
    %c0_i32 = arith.constant 0 : i32
    %c0_i32_0 = arith.constant 0 : i32
    %c0_i32_1 = arith.constant 0 : i32
    return %c0_i32, %c0_i32_0 : i32, i32
  }
  func.func @transform_1(%arg0: i32) -> (i32, i32) {
    %c0_i32 = arith.constant 0 : i32
    %c0_i32_0 = arith.constant 0 : i32
    return %c0_i32, %arg0 : i32, i32
  }
  func.func @transform_2(%arg0: i32) -> (i32, i32) {
    %c0_i32 = arith.constant 0 : i32
    %c0_i32_0 = arith.constant 0 : i32
    return %c0_i32, %arg0 : i32, i32
  }
}

</mosaic_0001>

<bundles_post_ra>
// kernel: tpu_custom_call.1
= control target key start
LH: loop header
LB: loop body
LE: loop exit
PB: predicated region body
PF: predicated region fallthrough
CT: control target
= control target key end

     0   :  { %7 = vsyncpa [#allocation3], 0  ;;  %s396_s0 = inlined_call_operand.hbm [shape: f32[16,16], index: 0, kind: input, shape index: {}]   ;;  %s397_s1 = inlined_call_operand.hbm [shape: f32[16,16], index: 1, kind: input, shape index: {}]   ;;  %s398_s2 = inlined_call_operand.hbm [shape: f32[16,16], index: 2, kind: output, shape index: {}]  }
   0x1   :  { %8 = vsyncpa [#allocation6], 0 }
   0x2   :  { %9 = vsyncpa [#allocation4], 0  ;;  %s14_s11 = sshll.u32 %s396_s0, 4  ;;  %s354_s12 = smov [#allocation2]   ;;  %s15_s11 = int_to_ptr.hbm [resolvable:$true] %s14_s11 }
   0x3   :  { %s16_s13 = sshll.u32 %s354_s12, 4  ;;  %s27_s16 = sshll.u32 %s397_s1, 4  ;;  %s17_s13 = int_to_ptr.vmem [resolvable:$true] %s16_s13  ;;  %s28_s16 = int_to_ptr.hbm [resolvable:$true] %s27_s16 }
   0x4   :  { %s355_s17 = smov 128   ;;  %s356_s18 = smov 8  }
   0x5   :  { %22 = dma.hbm_to_vmem [thread:$0]  %s15_s11, 256, %s17_s13, [#allocation3], %s355_s17, %s355_s17, %s356_s18  }
   0x6   :  { %s357_s19 = smov [#allocation5]  }
   0x7   :  { %s29_s20 = sshll.u32 %s357_s19, 4  ;;  %s30_s20 = int_to_ptr.vmem [resolvable:$true] %s29_s20 }
   0x8   :  { %35 = dma.hbm_to_vmem [thread:$0]  %s28_s16, 256, %s30_s20, [#allocation6], %s355_s17, %s355_s17, %s356_s18  }
   0x9   :  { %348 = dma.done.wait [#allocation3], 256  }
   0xa   :  { %349 = vsyncadd [#allocation3], 4294967040 }
   0xb   :  { %350 = dma.done.wait [#allocation6], 256  }
   0xc   :  { %351 = vsyncadd [#allocation6], 4294967040  ;;  %vm48_vm0 = vcmask 130048   ;;  %v47_v0 = vld [vmem:[#allocation5 + $0x8] sm:$0xff]  ;;  %v46_v1 = vld [vmem:[#allocation5] sm:$0xff]  ;;  %s358_s0 = smov [#allocation7]  }
   0xd   :  { %v45_v2 = vld [vmem:[#allocation2 + $0x8] sm:$0xff]  ;;  %v69_v3 = vand.u32 4294901760, %v47_v0  ;;  %v71_v4 = vand.u32 4294901760, %v46_v1  ;;  %v44_v6 = vld [vmem:[#allocation2] sm:$0xff]  ;;  %s251_s1 = sshll.u32 %s358_s0, 4  ;;  %s253_s23 = sshll.u32 %s398_s2, 4  ;;  %s252_s1 = int_to_ptr.vmem [resolvable:$true] %s251_s1  ;;  %s254_s23 = int_to_ptr.hbm [resolvable:$true] %s253_s23 }
   0xe   :  { %v53_v5 = vsel %vm48_vm0, %v45_v2, 0  ;;  %v50_v8 = vsel %vm48_vm0, %v44_v6, 0 }
   0xf   :  { %v81_v7 = vand.u32 4294901760, %v53_v5  ;;  %267 = vmatpush.msra.mxu2 %v69_v3  ;;  %v105_v9 = vsub.f32 %v47_v0, %v69_v3  ;;  %v111_v10 = vsub.f32 %v46_v1, %v71_v4  ;;  %70 = vmatpush.msra.mxu0 %v69_v3  ;;  %v73_v11 = vand.u32 4294901760, %v50_v8 }
  0x11   :  { %v82_v12 = vsub.f32 %v53_v5, %v81_v7  ;;  %268 = vmatpush.msra.mxu2 %v71_v4  ;;  %v106_v13 = vand.u32 4294901760, %v105_v9  ;;  %v112_v14 = vand.u32 4294901760, %v111_v10  ;;  %v74_v15 = vsub.f32 %v50_v8, %v73_v11  ;;  %72 = vmatpush.msra.mxu0 %v71_v4 }
  0x13   :  { %v83_v16 = vand.u32 4294901760, %v82_v12  ;;  %141 = vmatpush.msrb.mxu2 %v105_v9  ;;  %v107_v17 = vsub.f32 %v105_v9, %v106_v13  ;;  %v113_v18 = vsub.f32 %v111_v10, %v112_v14  ;;  %v75_v19 = vand.u32 4294901760, %v74_v15  ;;  %204 = vmatpush.msrb.mxu0 %v106_v13 }
  0x15   :  { %v84_v20 = vsub.f32 %v82_v12, %v83_v16  ;;  %144 = vmatpush.msrb.mxu2 %v111_v10  ;;  %v108_v21 = vand.u32 4294901760, %v107_v17  ;;  %v114_v22 = vand.u32 4294901760, %v113_v18  ;;  %v76_v23 = vsub.f32 %v74_v15, %v75_v19  ;;  %208 = vmatpush.msrb.mxu0 %v112_v14 }
  0x17   :  { %v85_v24 = vand.u32 4294901760, %v84_v20  ;;  %269 = vmatpush.msra.mxu3 %v108_v21  ;;  %109 = vmatpush.msra.mxu1 %v108_v21  ;;  %v77_v25 = vand.u32 4294901760, %v76_v23 }
  0x19   :  { %86 = vmatmul.f32.vlgmr.msra.gmra.mxu2 %v85_v24  ;;  %270 = vmatpush.msra.mxu3 %v114_v22 }
  0x1a   :  { %115 = vmatpush.msra.mxu1 %v114_v22  ;;  %121 = vmatmul.f32.vlgmr.msra.gmra.mxu3 %v81_v7 }
  0x1b   :  { %78 = vmatmul.f32.vlgmr.msra.gmra.mxu0 %v77_v25  ;;  %171 = vmatpush.msrb.mxu3 %v69_v3 }
  0x1c   :  { %117 = vmatmul.f32.vlgmr.msra.gmra.mxu1 %v73_v11 }
  0x1d   :  { %233 = vmatpush.msrb.mxu1 %v69_v3  ;;  %173 = vmatpush.msrb.mxu3 %v71_v4 }
  0x1f   :  { %235 = vmatpush.msrb.mxu1 %v71_v4 }
  0x21   :  { %147 = vmatmul.f32.vlgmr.msrb.gmra.mxu2 %v74_v15 }
  0x22   :  { %177 = vmatmul.f32.vlgmr.msrb.gmra.mxu3 %v75_v19 }
  0x23   :  { %210 = vmatmul.f32.vlgmr.msrb.gmra.mxu0 %v73_v11 }
  0x24   :  { %237 = vmatmul.f32.vlgmr.msrb.gmra.mxu1 %v73_v11 }
  0x29   :  { %152 = vmatmul.f32.gmra.mxu2 %v82_v12 }
  0x2a   :  { %183 = vmatmul.f32.gmra.mxu3 %v83_v16 }
  0x2b   :  { %214 = vmatmul.f32.gmra.mxu0 %v81_v7 }
  0x2c   :  { %241 = vmatmul.f32.gmra.mxu1 %v81_v7 }
  0x98   :  { %v79_v26 = vpop.f32.mrf.mxu0 }
  0x99   :  { %v118_v29 = vpop.f32.mrf.mxu1 }
  0x9a   :  { %v119_v30 = vadd.f32 %v118_v29, %v79_v26 }
  0x9c   :  { %v87_v27 = vpop.f32.mrf.mxu2 }
  0x9d   :  { %v122_v28 = vpop.f32.mrf.mxu3 }
  0x9e   :  { %v123_v38 = vadd.f32 %v122_v28, %v87_v27 }
  0xa0   :  { %v211_v32 = vpop.f32.mrf.mxu0 }
  0xa1   :  { %v238_v35 = vpop.f32.mrf.mxu1 }
  0xa4   :  { %v148_v31 = vpop.f32.mrf.mxu2 }
  0xa5   :  { %v149_v33 = vadd.f32 %v148_v31, %v119_v30  ;;  %v178_v34 = vpop.f32.mrf.mxu3 }
  0xa7   :  { %v179_v36 = vadd.f32 %v178_v34, %v149_v33 }
  0xa8   :  { %v215_v43 = vpop.f32.mrf.mxu0 }
  0xa9   :  { %v212_v37 = vadd.f32 %v211_v32, %v179_v36  ;;  %v242_v45 = vpop.f32.mrf.mxu1 }
  0xab   :  { %v239_v39 = vadd.f32 %v238_v35, %v212_v37 }
  0xac   :  { %v153_v40 = vpop.f32.mrf.mxu2 }
  0xad   :  { %245 = vst.msk [vmem:[#allocation7] sm:$0xff] %vm48_vm0, %v239_v39  ;;  %v154_v41 = vadd.f32 %v153_v40, %v123_v38  ;;  %v184_v42 = vpop.f32.mrf.mxu3 }
  0xaf   :  { %v185_v44 = vadd.f32 %v184_v42, %v154_v41 }
  0xb1   :  { %v216_v46 = vadd.f32 %v215_v43, %v185_v44 }
  0xb3   :  { %v243_v47 = vadd.f32 %v242_v45, %v216_v46 }
  0xb5   :  { %246 = vst.msk [vmem:[#allocation7 + $0x8] sm:$0xff] %vm48_vm0, %v243_v47 }
  0xb6   :  { %259 = dma.vmem_to_hbm [thread:$0]  %s252_s1, 256, %s254_s23, [#allocation4], %s355_s17, %s355_s17, %s356_s18  }
  0xb7   :  { %352 = dma.done.wait [#allocation4], 256  }
  0xb8   :  { %353 = vsyncadd [#allocation4], 4294967040 }
  0xb9   :  { %264 = vsyncpa [#allocation3], 1 }
  0xba   :  { %265 = vsyncpa [#allocation6], 1 }
  0xbb   :  { %266 = vsyncpa [#allocation4], 1 }

</bundles_post_ra>
